<compile_context>
chip_gen: v7x
topology: tpu7x:2x2x1
jax: 0.10.0
libtpu: 0.0.40
codegen_flags: <defaults>
</compile_context>

<pallas_src>
import math

import jax
import jax.numpy as jnp
from jax.experimental import pallas as pl
from jax.experimental.pallas import tpu as pltpu

_LANE_CANDIDATES = (1024, 512, 256, 128)
_MAX_BLOCK_BYTES = 4 * 1024 * 1024      # ~4 MiB block; x2 buffers x (in+out) ~ 16 MiB
_SMALL_IMAGE_BYTES = 2 * 1024 * 1024    # whole-image single-block path for odd sizes
_MIN_GRID_STEPS = 4                     # keep the pipeline (and v7x megacore) busy
_VMEM_LIMIT_BYTES = 32 * 1024 * 1024    # safe on v5e/v6e/v7x, leaves headroom


def _ceil_div(a, b):
    return -(-a // b)


def _adjust_contrast_kernel(cf_ref, x_ref, o_ref):
    # cf_ref: SMEM (B,) prefetched per-batch contrast factor (f32)
    # x_ref / o_ref: VMEM tile of shape (1, tile_rows, lane)
    b = pl.program_id(0)
    cf = cf_ref[b]
    # Keep the clip inside the kernel: the ragged last row-tile computes on
    # uninitialized padding rows that are masked on writeback.
    o_ref[...] = jnp.clip(x_ref[...] * cf, 0.0, 1.0).astype(o_ref.dtype)


def _select_layout(B, P, itemsize):
    """Return (lane, rows, tile_rows, pad_elems) for the (B, rows, lane) view."""
    # Path A: lane-dense, zero padding (lane divides P exactly).
    lane = None
    for cand in _LANE_CANDIDATES:
        if P % cand == 0:
            lane = cand
            break
    if lane is None:
        if P * itemsize <= _SMALL_IMAGE_BYTES:
            # Path B: one (1, 1, P) block per image; block == full dims is legal
            # for any P, so no padding and no output slice.
            return P, 1, 1, 0
        # Path C (rare): pad to the next multiple of 128 (minimal padding).
        lane = 128

    rows = _ceil_div(P, lane)
    pad = rows * lane - P

    sub = 8 * max(1, 4 // itemsize)             # sublane granularity for dtype
    if rows <= sub:
        return lane, rows, rows, pad            # single full-dim block

    max_rows = max(sub, (_MAX_BLOCK_BYTES // (lane * itemsize)) // sub * sub)
    tile_rows = min(max_rows, _ceil_div(rows, sub) * sub)
    if B * _ceil_div(rows, tile_rows) < _MIN_GRID_STEPS:
        # Too few grid steps for pipelining / megacore: split each image.
        want_tiles = _ceil_div(_MIN_GRID_STEPS, B)
        tile_rows = max(sub, _ceil_div(_ceil_div(rows, want_tiles), sub) * sub)
    if _ceil_div(rows, tile_rows) == 1:
        tile_rows = rows                        # exact full-dim block, no waste
    return lane, rows, tile_rows, pad


@jax.jit
def adjust_contrast(x, contrast_factor):
    """x: (B, ...) floating image in [0, 1]; contrast_factor: scalar, (1,) or (B,)."""
    if not jnp.issubdtype(x.dtype, jnp.floating):
        raise TypeError(f"adjust_contrast expects a floating-point image, got {x.dtype}")
    B = x.shape[0]
    P = math.prod(x.shape[1:])
    itemsize = jnp.dtype(x.dtype).itemsize

    # Mirror PyTorch broadcasting: a length-1 factor applies to every batch elem.
    cf = jnp.asarray(contrast_factor, dtype=jnp.float32).reshape(-1)
    cf = jnp.broadcast_to(cf, (B,))
    # TODO(synk): the PyTorch reference raises on negative factors at runtime;
    # data-dependent error raising has no clean jit/Pallas equivalent.

    lane, rows, tile_rows, pad = _select_layout(B, P, itemsize)

    x_flat = x.reshape(B, P)
    if pad:
        x_flat = jnp.pad(x_flat, ((0, 0), (0, pad)))
    x3 = x_flat.reshape(B, rows, lane)
    num_row_tiles = _ceil_div(rows, tile_rows)

    out3 = pl.pallas_call(
        _adjust_contrast_kernel,
        out_shape=jax.ShapeDtypeStruct((B, rows, lane), x.dtype),
        grid_spec=pltpu.PrefetchScalarGridSpec(
            num_scalar_prefetch=1,                     # cf -> SMEM, resident for all steps
            grid=(B, num_row_tiles),                   # fast axis streams contiguous HBM
            in_specs=[
                pl.BlockSpec((1, tile_rows, lane), lambda b, r, cf: (b, r, 0)),
            ],
            out_specs=pl.BlockSpec((1, tile_rows, lane), lambda b, r, cf: (b, r, 0)),
        ),
        compiler_params=pltpu.CompilerParams(
            dimension_semantics=("parallel", "parallel"),
            vmem_limit_bytes=_VMEM_LIMIT_BYTES,
        ),
    )(cf, x3)

    out_flat = out3.reshape(B, rows * lane)
    if pad:
        out_flat = out_flat[:, :P]
    return out_flat.reshape(x.shape)


class AdjustContrast:
    """JAX/Pallas equivalent of kornia.enhance.AdjustContrast."""

    def __init__(self, contrast_factor):
        self.contrast_factor = contrast_factor

    def __call__(self, x):
        return adjust_contrast(x, self.contrast_factor)


if __name__ == "__main__":
    key = jax.random.PRNGKey(0)
    k1, k2, k3 = jax.random.split(key, 3)

    # Main case: per-batch factors, flattened size divisible by 1024 (no-pad fast path).
    B, C, H, W = 2, 4, 16, 16
    x = jax.random.uniform(k1, (B, C, H, W), dtype=jnp.float32)
    contrast = jnp.array([0.5, 1.3], dtype=jnp.float32)

    module = AdjustContrast(contrast)
    out = jax.block_until_ready(module(x))
    ref = jnp.clip(x * contrast.reshape(B, 1, 1, 1), 0.0, 1.0)
    assert out.shape == x.shape and out.dtype == x.dtype
    assert jnp.allclose(out, ref, atol=1e-6), "mismatch vs reference (per-batch)"

    # Scalar-factor path (same factor applied to every batch element).
    out2 = jax.block_until_ready(AdjustContrast(0.75)(x))
    ref2 = jnp.clip(x * 0.75, 0.0, 1.0)
    assert jnp.allclose(out2, ref2, atol=1e-6), "mismatch vs reference (scalar)"

    # Small shape whose flattened size is not a multiple of 128 -> whole-image block path.
    x3 = jax.random.uniform(k2, (2, 3, 20, 20), dtype=jnp.float32)
    c3 = jnp.array([0.9, 1.1], dtype=jnp.float32)
    out3 = jax.block_until_ready(AdjustContrast(c3)(x3))
    ref3 = jnp.clip(x3 * c3.reshape(2, 1, 1, 1), 0.0, 1.0)
    assert jnp.allclose(out3, ref3, atol=1e-6), "mismatch vs reference (whole-image block)"

    # Larger non-divisible shape -> minimal-pad fallback path with ragged last tile.
    x4 = jax.random.uniform(k3, (1, 3, 450, 500), dtype=jnp.float32)
    out4 = jax.block_until_ready(AdjustContrast(1.2)(x4))
    ref4 = jnp.clip(x4 * 1.2, 0.0, 1.0)
    assert jnp.allclose(out4, ref4, atol=1e-6), "mismatch vs reference (pad fallback)"

    print("KERNEL_OK")
</pallas_src>

<mosaic_0001>
module attributes {stable_mosaic.version = 11 : i64} {
  func.func @_adjust_contrast_kernel(%arg0: i32, %arg1: i32, %arg2: memref<2xf32, #tpu.memory_space<smem>>, %arg3: memref<1x1x1024xf32, #tpu.memory_space<vmem>>, %arg4: memref<1x1x1024xf32, #tpu.memory_space<vmem>>) attributes {dimension_semantics = [#tpu.dimension_semantics<parallel>, #tpu.dimension_semantics<parallel>], iteration_bounds = array<i64: 2, 1>, scalar_prefetch = 1 : i64, scratch_operands = 0 : i64, tpu.core_type = #tpu.core_type<tc>, window_params = [{transform_indices = @transform_0, window_bounds = array<i64: 1, 1, 1024>}, {transform_indices = @transform_1, window_bounds = array<i64: 1, 1, 1024>}]} {
    %0 = arith.index_cast %arg0 : i32 to index
    %1 = memref.load %arg2[%0] : memref<2xf32, #tpu.memory_space<smem>>
    %c0 = arith.constant 0 : index
    %c0_0 = arith.constant 0 : index
    %c0_1 = arith.constant 0 : index
    %2 = vector.load %arg3[%c0, %c0_0, %c0_1] : memref<1x1x1024xf32, #tpu.memory_space<vmem>>, vector<1x1x1024xf32>
    %3 = vector.broadcast %1 : f32 to vector<1x1x1024xf32>
    %4 = arith.mulf %2, %3 : vector<1x1x1024xf32>
    %cst = arith.constant 0.000000e+00 : f32
    %cst_2 = arith.constant 1.000000e+00 : f32
    %5 = vector.broadcast %cst : f32 to vector<1x1x1024xf32>
    %6 = arith.maximumf %5, %4 : vector<1x1x1024xf32>
    %7 = vector.broadcast %cst_2 : f32 to vector<1x1x1024xf32>
    %8 = arith.minimumf %7, %6 : vector<1x1x1024xf32>
    %c0_3 = arith.constant 0 : index
    %c0_4 = arith.constant 0 : index
    %c0_5 = arith.constant 0 : index
    %9 = vector.load %arg4[%c0_3, %c0_4, %c0_5] : memref<1x1x1024xf32, #tpu.memory_space<vmem>>, vector<1x1x1024xf32>
    tpu.vector_store %arg4[%c0_3, %c0_4, %c0_5], %8 {strides = array<i32>} : memref<1x1x1024xf32, #tpu.memory_space<vmem>>, vector<1x1x1024xf32>,
    return
  }
  func.func @transform_0(%arg0: i32, %arg1: i32, %arg2: memref<2xf32, #tpu.memory_space<smem>>) -> (i32, i32, i32) {
    %c0_i32 = arith.constant 0 : i32
    %c0_i32_0 = arith.constant 0 : i32
    return %arg0, %arg1, %c0_i32 : i32, i32, i32
  }
  func.func @transform_1(%arg0: i32, %arg1: i32, %arg2: memref<2xf32, #tpu.memory_space<smem>>) -> (i32, i32, i32) {
    %c0_i32 = arith.constant 0 : i32
    %c0_i32_0 = arith.constant 0 : i32
    return %arg0, %arg1, %c0_i32 : i32, i32, i32
  }
}

</mosaic_0001>

<bundles_post_ra>
// kernel: adjust_contrast.1
= control target key start
LH: loop header
LB: loop body
LE: loop exit
PB: predicated region body
PF: predicated region fallthrough
CT: control target
= control target key end

     0   :  { %s357_s0 = inlined_call_operand.vmem [shape: f32[2], index: 0, kind: input, shape index: {}]   ;;  %s358_s1 = inlined_call_operand.vmem [shape: f32[2,1,1024], index: 1, kind: input, shape index: {}]   ;;  %s359_s2 = inlined_call_operand.vmem [shape: f32[2,1,1024], index: 2, kind: output, shape index: {}]  }
   0x1   :  { %s7_s11 = sshll.u32 %s357_s0, 4  ;;  %s8_s11 = int_to_ptr.vmem [resolvable:$true] %s7_s11 }
   0x2   :  { %s279_s12 = scalar_lea.vmem %s8_s11, 16  ;;  %p284_p1 = scmp.lt.s32.totalorder %s8_s11, %s8_s11 }
   0x3   :  { %p280_p0 = scmp.ne.s32.totalorder %s8_s11, %s279_s12  ;;  %p285_p2 = scmp.lt.s32.totalorder %s279_s12, %s279_s12 }
   0x5   :  { %p286_p3 = por %p285_p2, %p284_p1 }
   0x7   :  { %p287_p4 = pnand %p286_p3, %p280_p0 }
   0x9   :  { %290 = shalt.err (!%p287_p4)  }
   0xa   :  { %s317_s13 = smov [#allocation3]  }
   0xb   :  { %10 = dma.vmem_to_smem %s8_s11, 16, %s317_s13, [#allocation2] }
   0xc   :  { %303 = dma.done.wait [#allocation2], 16 }
   0xd   :  { %304 = vsyncadd [#allocation2], 4294967280 }
   0xe   :  { %12 = sfence }
   0xf   :  { %s336_s14 = smov 0   ;;  %s338_s15 = smov 0  }
  0x10   :  { %s340_s16 = smov 0  }
  0x11 LB: > { %s30_s0 = sadd.s32 1, %s311_s15  ;;  %p249_p5 = scmp.ge.s32.totalorder %s315_s16, 1  ;;  %s315_s16 = sphi %s340_s16, %s18_s16   ;;  %s311_s15 = sphi %s338_s15, %s361_s15   ;;  %s307_s14 = sphi %s336_s14, %s360_s14  }
  0x12   : > { %p32_p6 = scmp.ge.s32.totalorder %s30_s0, 2  ;;  %p113_p7 = scmp.lt.s32.totalorder %s315_s16, 3 }
  0x14   : > { %s363_s0 = smov (%p32_p6, %s30_s0), 0  ;;  %p114_p8 = pnand %p249_p5, %p113_p7 }
  0x15   : > { %p139_p9 = scmp.lt.s32.totalorder (!%p114_p8), %s307_s14, 1  ;;  %s155_s17 = sld [smem:[#allocation3 + %s307_s14]] (!%p114_p8) }
  0x16   : > { %117 = sbr.rel (%p114_p8) target bundleno = 40 (0x28), region = 24 }
  0x1b   : > { %v157_v1 = vstv (!%p114_p8), %s155_s17 }
  0x1d   : > { %s365_s14 = smov (!%p139_p9, %s307_s14), 1 }
  0x1e   : > { %s250_s18 = sshll.u32 %s365_s14, 3 }
  0x1f   : > { %s146_s21 = scalar_lea.vmem %s358_s1, %s250_s18  ;;  %s154_s24 = scalar_lea.vmem %s359_s2, %s250_s18 }
  0x20   : > { %v156_v0 = vld [vmem:[%s146_s21] sm:$0xff] }
  0x21   : > { %v158_v2 = vmul.f32 %v157_v1, %v156_v0 }
  0x23   : > { %v159_v3 = vmax.f32 %v158_v2, 0.0 }
  0x25   : > { %v160_v4 = vmin.f32 %v159_v3, 1.0 }
  0x27   : > { %161 = vst [vmem:[%s154_s24] sm:$0xff] %v160_v4 }
  0x28 PF: > { %s18_s16 = sadd.s32 1, %s315_s16   ;;  %s360_s14 = smov %s311_s15 }
  0x29   : > { %p15_p10 = scmp.ge.s32.totalorder %s18_s16, 4   ;;  %s361_s15 = smov %s363_s0 }
  0x2b   :  { %17 = sbr.rel (!%p15_p10) target bundleno = 17 (0x11), region = 54 }

</bundles_post_ra>
